<compile_context>
chip_gen: v6e
topology: v6e:2x2x1
jax: 0.10.0
libtpu: 0.0.40
codegen_flags: <defaults>
</compile_context>

<pallas_src>
import functools

import jax
import jax.numpy as jnp
from jax import lax
from jax.experimental import pallas as pl
from jax.experimental.pallas import tpu as pltpu


def aag_kernel(x_ref, w1_ref, b1_ref, w2_ref, b2_ref, wsp9_ref, mask9_ref,
               bsp_ref, o_ref, *, G, W):
    HW = x_ref.shape[-1]
    Cr = w1_ref.shape[0]

    # Weights / constants loaded once per grid step (hoisted out of the image loop).
    w1 = w1_ref[...]                                      # (Cr, C)
    b1 = b1_ref[...]                                      # (Cr, 1)
    w2 = w2_ref[...]                                      # (C, Cr)
    b2 = b2_ref[...]                                      # (C, 1)
    wsp9 = wsp9_ref[...]                                  # (9, C)  [ky*3+kx, c]
    m9 = mask9_ref[...]                                   # (9, HW) border-validity mask
    bsp = bsp_ref[0]                                      # scalar spatial bias (SMEM)

    # Row k of the tap stack uses dx = k % 3 - 1 (static select pattern).
    col = lax.broadcasted_iota(jnp.int32, (9, 1), 0) % 3

    for g in range(G):                                    # unrolled; images independent
        x = x_ref[g]                                      # (C, HW), input dtype

        # ---- channel attention: 1x1 conv -> relu -> 1x1 conv -> sigmoid ----
        h = jnp.maximum(
            jnp.dot(w1, x, preferred_element_type=jnp.float32) + b1, 0.0)  # (Cr, HW)
        if Cr <= 4:
            # K=Cr matmul would use only Cr of 256 MXU rows -> do it on the VPU.
            pre = b2 + w2[:, 0:1] * h[0:1, :]
            for r in range(1, Cr):
                pre = pre + w2[:, r:r + 1] * h[r:r + 1, :]
        else:
            pre = jnp.dot(w2, h, preferred_element_type=jnp.float32) + b2
        cw = jax.nn.sigmoid(pre)                          # (C, HW) f32
        x1 = x.astype(jnp.float32) * cw                   # lane-dense gating

        # ---- spatial attention: 3x3 conv (C -> 1, pad=1) + sigmoid ---------
        # Per-tap channel sums in one matmul (bf16 operands stay bf16 on MXU).
        taps = jnp.dot(wsp9, x1.astype(x_ref.dtype),
                       preferred_element_type=jnp.float32)        # (9, HW)

        # dx shifts: two whole-stack lane rolls, static per-row select.
        a = pltpu.roll(taps, shift=HW - 1, axis=1)        # a[k][q] = taps[k][q+1]
        b = pltpu.roll(taps, shift=1, axis=1)             # b[k][q] = taps[k][q-1]
        s = jnp.where(col == 2, a, jnp.where(col == 0, b, taps))

        # dy shifts: one group roll per off-center row band, then masked sums.
        top = pltpu.roll(s[0:3], shift=W, axis=1)         # dy = -1: s[k][q-W]
        mid = s[3:6]                                      # dy =  0
        bot = pltpu.roll(s[6:9], shift=HW - W, axis=1)    # dy = +1: s[k][q+W]
        acc = (jnp.sum(top * m9[0:3], axis=0, keepdims=True)
               + jnp.sum(mid * m9[3:6], axis=0, keepdims=True)
               + jnp.sum(bot * m9[6:9], axis=0, keepdims=True))   # (1, HW)

        sw = jax.nn.sigmoid(acc + bsp)                    # (1, HW)

        # Sublane-broadcast gate; (C, HW) store is aligned and lane-dense.
        o_ref[g] = (x1 * sw).astype(o_ref.dtype)


def _dual_tensorcore_chip():
    """True on chips where a 'parallel' grid axis shards across 2 TensorCores."""
    try:
        kind = jax.devices()[0].device_kind.lower()
    except Exception:
        return False
    return any(tag in kind for tag in ("v7", "7x", "v4", "v5p", "v5 p"))


def adaptive_attention_gate(x_nchw, params):
    """params = (w1 (Cr,C), b1 (Cr,), w2 (C,Cr), b2 (C,), wsp (C,3,3), bsp (1,))."""
    w1, b1, w2, b2, wsp, bsp = params
    N, C, H, W = x_nchw.shape
    Cr = w1.shape[0]
    HW = H * W

    # Grid shaping: one step for all N images on single-TC chips (v5e/v6e),
    # 2-way parallel split on dual-TC chips (v7x / megacore) when N allows.
    n_blocks = 2 if (_dual_tensorcore_chip() and N % 2 == 0 and N >= 2) else 1
    G = N // n_blocks                                     # images per grid step

    x = x_nchw.reshape(N, C, HW)                          # free reshape, stays NCHW
    wsp9 = jnp.transpose(wsp, (1, 2, 0)).reshape(9, C)    # [ky*3+kx, c]

    # Precomputed per-image border-validity mask (hoisted out of the kernel).
    pcol = jnp.arange(HW, dtype=jnp.int32)
    ii, jj = pcol // W, pcol % W
    rows = []
    for k in range(9):
        dy, dx = k // 3 - 1, k % 3 - 1
        rows.append((ii + dy >= 0) & (ii + dy < H) & (jj + dx >= 0) & (jj + dx < W))
    mask9 = jnp.stack(rows).astype(jnp.float32)           # (9, HW)

    kernel = functools.partial(aag_kernel, G=G, W=W)
    out = pl.pallas_call(
        kernel,
        out_shape=jax.ShapeDtypeStruct((N, C, HW), x_nchw.dtype),
        grid=(n_blocks,),
        in_specs=[
            pl.BlockSpec((G, C, HW), lambda n: (n, 0, 0)),
            pl.BlockSpec((Cr, C), lambda n: (0, 0)),
            pl.BlockSpec((Cr, 1), lambda n: (0, 0)),
            pl.BlockSpec((C, Cr), lambda n: (0, 0)),
            pl.BlockSpec((C, 1), lambda n: (0, 0)),
            pl.BlockSpec((9, C), lambda n: (0, 0)),
            pl.BlockSpec((9, HW), lambda n: (0, 0)),
            pl.BlockSpec(memory_space=pltpu.MemorySpace.SMEM),   # scalar bias
        ],
        out_specs=pl.BlockSpec((G, C, HW), lambda n: (n, 0, 0)),
        compiler_params=pltpu.CompilerParams(
            dimension_semantics=("parallel",)),
    )(x, w1, b1.reshape(Cr, 1), w2, b2.reshape(C, 1), wsp9, mask9,
      bsp.reshape(1))
    return out.reshape(N, C, H, W)


def reference(x, params):
    """Pure-JAX (XLA) reference of the PyTorch forward, NCHW."""
    w1, b1, w2, b2, wsp, bsp = params
    h = jax.nn.relu(jnp.einsum('rc,nchw->nrhw', w1, x) + b1[None, :, None, None])
    cw = jax.nn.sigmoid(jnp.einsum('cr,nrhw->nchw', w2, h) + b2[None, :, None, None])
    x1 = x * cw
    s = lax.conv_general_dilated(
        x1, wsp[None], window_strides=(1, 1), padding='SAME',
        dimension_numbers=('NCHW', 'OIHW', 'NCHW'))       # (N, 1, H, W)
    return x1 * jax.nn.sigmoid(s + bsp[0])


if __name__ == "__main__":
    N, C, H, W = 2, 32, 16, 16
    reduction_ratio = 16
    Cr = C // reduction_ratio                             # 2

    key = jax.random.PRNGKey(0)
    kx, k1, k2, k3, k4, k5, k6 = jax.random.split(key, 7)

    x_nchw = jax.random.normal(kx, (N, C, H, W), jnp.float32)

    # Parameter shapes match the nn.Module's convs (1x1 weights squeezed).
    w1 = 0.1 * jax.random.normal(k1, (Cr, C), jnp.float32)    # conv1x1 C->Cr
    b1 = 0.1 * jax.random.normal(k2, (Cr,), jnp.float32)
    w2 = 0.1 * jax.random.normal(k3, (C, Cr), jnp.float32)    # conv1x1 Cr->C
    b2 = 0.1 * jax.random.normal(k4, (C,), jnp.float32)
    wsp = 0.1 * jax.random.normal(k5, (C, 3, 3), jnp.float32)  # conv3x3 C->1
    bsp = 0.1 * jax.random.normal(k6, (1,), jnp.float32)
    params = (w1, b1, w2, b2, wsp, bsp)

    out = jax.block_until_ready(adaptive_attention_gate(x_nchw, params))
    ref = jax.block_until_ready(reference(x_nchw, params))

    assert out.shape == (N, C, H, W)
    assert jnp.allclose(out, ref, atol=2e-3, rtol=2e-3), float(
        jnp.max(jnp.abs(out - ref)))

    print("KERNEL_OK")
</pallas_src>

<mosaic_0001>
module attributes {stable_mosaic.version = 11 : i64} {
  func.func @aag_kernel(%arg0: i32, %arg1: memref<2x32x256xf32, #tpu.memory_space<vmem>>, %arg2: memref<2x32xf32, #tpu.memory_space<vmem>>, %arg3: memref<2x1xf32, #tpu.memory_space<vmem>>, %arg4: memref<32x2xf32, #tpu.memory_space<vmem>>, %arg5: memref<32x1xf32, #tpu.memory_space<vmem>>, %arg6: memref<9x32xf32, #tpu.memory_space<vmem>>, %arg7: memref<9x256xf32, #tpu.memory_space<vmem>>, %arg8: memref<1xf32, #tpu.memory_space<smem>>, %arg9: memref<2x32x256xf32, #tpu.memory_space<vmem>>) attributes {dimension_semantics = [#tpu.dimension_semantics<parallel>], iteration_bounds = array<i64: 1>, scalar_prefetch = 0 : i64, scratch_operands = 0 : i64, tpu.core_type = #tpu.core_type<tc>, window_params = [{transform_indices = @transform_0, window_bounds = array<i64: 2, 32, 256>}, {pipeline_mode = #tpu.pipeline_mode<synchronous>, transform_indices = @transform_1, window_bounds = array<i64: 2, 32>}, {pipeline_mode = #tpu.pipeline_mode<synchronous>, transform_indices = @transform_2, window_bounds = array<i64: 2, 1>}, {pipeline_mode = #tpu.pipeline_mode<synchronous>, transform_indices = @transform_3, window_bounds = array<i64: 32, 2>}, {pipeline_mode = #tpu.pipeline_mode<synchronous>, transform_indices = @transform_4, window_bounds = array<i64: 32, 1>}, {pipeline_mode = #tpu.pipeline_mode<synchronous>, transform_indices = @transform_5, window_bounds = array<i64: 9, 32>}, {pipeline_mode = #tpu.pipeline_mode<synchronous>, transform_indices = @transform_6, window_bounds = array<i64: 9, 256>}, {transform_indices = @transform_7, window_bounds = array<i64: 1>}, {transform_indices = @transform_8, window_bounds = array<i64: 2, 32, 256>}]} {
    %c0 = arith.constant 0 : index
    %c0_0 = arith.constant 0 : index
    %0 = vector.load %arg2[%c0, %c0_0] : memref<2x32xf32, #tpu.memory_space<vmem>>, vector<2x32xf32>
    %c0_1 = arith.constant 0 : index
    %c0_2 = arith.constant 0 : index
    %1 = vector.load %arg3[%c0_1, %c0_2] : memref<2x1xf32, #tpu.memory_space<vmem>>, vector<2x1xf32>
    %c0_3 = arith.constant 0 : index
    %c0_4 = arith.constant 0 : index
    %2 = vector.load %arg4[%c0_3, %c0_4] : memref<32x2xf32, #tpu.memory_space<vmem>>, vector<32x2xf32>
    %c0_5 = arith.constant 0 : index
    %c0_6 = arith.constant 0 : index
    %3 = vector.load %arg5[%c0_5, %c0_6] : memref<32x1xf32, #tpu.memory_space<vmem>>, vector<32x1xf32>
    %c0_7 = arith.constant 0 : index
    %c0_8 = arith.constant 0 : index
    %4 = vector.load %arg6[%c0_7, %c0_8] : memref<9x32xf32, #tpu.memory_space<vmem>>, vector<9x32xf32>
    %c0_9 = arith.constant 0 : index
    %c0_10 = arith.constant 0 : index
    %5 = vector.load %arg7[%c0_9, %c0_10] : memref<9x256xf32, #tpu.memory_space<vmem>>, vector<9x256xf32>
    %c0_11 = arith.constant 0 : index
    %6 = memref.load %arg8[%c0_11] : memref<1xf32, #tpu.memory_space<smem>>
    %7 = tpu.iota {dimensions = array<i32: 0>} : vector<9x1xi32>
    %c3_i32 = arith.constant 3 : i32
    %c0_i32 = arith.constant 0 : i32
    %8 = arith.cmpi eq, %c3_i32, %c0_i32 : i32
    %c1_i32 = arith.constant 1 : i32
    %9 = arith.select %8, %c1_i32, %c3_i32 : i32
    %10 = vector.broadcast %9 : i32 to vector<9x1xi32>
    %11 = arith.remsi %7, %10 : vector<9x1xi32>
    %c0_i32_12 = arith.constant 0 : i32
    %12 = vector.broadcast %c0_i32_12 : i32 to vector<9x1xi32>
    %13 = arith.cmpi ne, %11, %12 : vector<9x1xi32>
    %c0_i32_13 = arith.constant 0 : i32
    %14 = vector.broadcast %c0_i32_13 : i32 to vector<9x1xi32>
    %15 = arith.cmpi slt, %11, %14 : vector<9x1xi32>
    %c0_i32_14 = arith.constant 0 : i32
    %16 = arith.cmpi slt, %9, %c0_i32_14 : i32
    %17 = vector.broadcast %16 : i1 to vector<9x1xi1>
    %18 = vector.broadcast %17 : vector<9x1xi1> to vector<9x1xi1>
    %19 = arith.xori %15, %18 : vector<9x1xi1>
    %20 = arith.andi %19, %13 : vector<9x1xi1>
    %21 = vector.broadcast %9 : i32 to vector<9x1xi32>
    %22 = arith.addi %11, %21 : vector<9x1xi32>
    %23 = arith.select %20, %22, %11 : vector<9x1xi1>, vector<9x1xi32>
    %c0_15 = arith.constant 0 : index
    %c0_16 = arith.constant 0 : index
    %c0_17 = arith.constant 0 : index
    %24 = vector.load %arg1[%c0_15, %c0_16, %c0_17] : memref<2x32x256xf32, #tpu.memory_space<vmem>>, vector<1x32x256xf32>
    %25 = vector.shape_cast %24 : vector<1x32x256xf32> to vector<32x256xf32>
    %cst = arith.constant dense<0.000000e+00> : vector<2x256xf32>
    %26 = tpu.matmul %0, %25, %cst {dimension_numbers = #tpu.dot_dimension_numbers<[1], [0], [0], [1], [0, 0, 1, 1], [], []>} : vector<2x32xf32>, vector<32x256xf32>, vector<2x256xf32> -> vector<2x256xf32>
    %27 = vector.broadcast %1 : vector<2x1xf32> to vector<2x256xf32>
    %28 = arith.addf %26, %27 : vector<2x256xf32>
    %cst_18 = arith.constant 0.000000e+00 : f32
    %29 = vector.broadcast %cst_18 : f32 to vector<2x256xf32>
    %30 = arith.maximumf %28, %29 : vector<2x256xf32>
    %31 = vector.extract_strided_slice %2 {offsets = [0, 0], sizes = [32, 1], strides = [1, 1]} : vector<32x2xf32> to vector<32x1xf32>
    %32 = vector.extract_strided_slice %30 {offsets = [0, 0], sizes = [1, 256], strides = [1, 1]} : vector<2x256xf32> to vector<1x256xf32>
    %33 = vector.broadcast %31 : vector<32x1xf32> to vector<32x256xf32>
    %34 = vector.broadcast %32 : vector<1x256xf32> to vector<32x256xf32>
    %35 = arith.mulf %33, %34 : vector<32x256xf32>
    %36 = vector.broadcast %3 : vector<32x1xf32> to vector<32x256xf32>
    %37 = arith.addf %36, %35 : vector<32x256xf32>
    %38 = vector.extract_strided_slice %2 {offsets = [0, 1], sizes = [32, 1], strides = [1, 1]} : vector<32x2xf32> to vector<32x1xf32>
    %39 = vector.extract_strided_slice %30 {offsets = [1, 0], sizes = [1, 256], strides = [1, 1]} : vector<2x256xf32> to vector<1x256xf32>
    %40 = vector.broadcast %38 : vector<32x1xf32> to vector<32x256xf32>
    %41 = vector.broadcast %39 : vector<1x256xf32> to vector<32x256xf32>
    %42 = arith.mulf %40, %41 : vector<32x256xf32>
    %43 = arith.addf %37, %42 : vector<32x256xf32>
    %44 = arith.negf %43 : vector<32x256xf32>
    %45 = math.exp %44 : vector<32x256xf32>
    %cst_19 = arith.constant 1.000000e+00 : f32
    %46 = vector.broadcast %cst_19 : f32 to vector<32x256xf32>
    %47 = arith.addf %46, %45 : vector<32x256xf32>
    %48 = arith.divf %46, %47 : vector<32x256xf32>
    %49 = arith.mulf %25, %48 : vector<32x256xf32>
    %cst_20 = arith.constant dense<0.000000e+00> : vector<9x256xf32>
    %50 = tpu.matmul %4, %49, %cst_20 {dimension_numbers = #tpu.dot_dimension_numbers<[1], [0], [0], [1], [0, 0, 1, 1], [], []>} : vector<9x32xf32>, vector<32x256xf32>, vector<9x256xf32> -> vector<9x256xf32>
    %c255_i32 = arith.constant 255 : i32
    %51 = tpu.dynamic_rotate %50 by %c255_i32 dim 1 : vector<9x256xf32>, i32 -> vector<9x256xf32>
    %c1_i32_21 = arith.constant 1 : i32
    %52 = tpu.dynamic_rotate %50 by %c1_i32_21 dim 1 : vector<9x256xf32>, i32 -> vector<9x256xf32>
    %c2_i32 = arith.constant 2 : i32
    %53 = vector.broadcast %c2_i32 : i32 to vector<9x1xi32>
    %54 = arith.cmpi eq, %23, %53 : vector<9x1xi32>
    %c0_i32_22 = arith.constant 0 : i32
    %55 = vector.broadcast %c0_i32_22 : i32 to vector<9x1xi32>
    %56 = arith.cmpi eq, %23, %55 : vector<9x1xi32>
    %57 = vector.shape_cast %56 : vector<9x1xi1> to vector<9x1xi1>
    %58 = vector.broadcast %57 : vector<9x1xi1> to vector<9x256xi1>
    %59 = arith.select %58, %52, %50 : vector<9x256xi1>, vector<9x256xf32>
    %60 = vector.shape_cast %54 : vector<9x1xi1> to vector<9x1xi1>
    %61 = vector.broadcast %60 : vector<9x1xi1> to vector<9x256xi1>
    %62 = arith.select %61, %51, %59 : vector<9x256xi1>, vector<9x256xf32>
    %63 = vector.extract_strided_slice %62 {offsets = [0, 0], sizes = [3, 256], strides = [1, 1]} : vector<9x256xf32> to vector<3x256xf32>
    %c16_i32 = arith.constant 16 : i32
    %64 = tpu.dynamic_rotate %63 by %c16_i32 dim 1 : vector<3x256xf32>, i32 -> vector<3x256xf32>
    %65 = vector.extract_strided_slice %62 {offsets = [3, 0], sizes = [3, 256], strides = [1, 1]} : vector<9x256xf32> to vector<3x256xf32>
    %66 = vector.extract_strided_slice %62 {offsets = [6, 0], sizes = [3, 256], strides = [1, 1]} : vector<9x256xf32> to vector<3x256xf32>
    %c240_i32 = arith.constant 240 : i32
    %67 = tpu.dynamic_rotate %66 by %c240_i32 dim 1 : vector<3x256xf32>, i32 -> vector<3x256xf32>
    %68 = vector.extract_strided_slice %5 {offsets = [0, 0], sizes = [3, 256], strides = [1, 1]} : vector<9x256xf32> to vector<3x256xf32>
    %69 = arith.mulf %64, %68 : vector<3x256xf32>
    %cst_23 = arith.constant dense<0.000000e+00> : vector<256xf32>
    %70 = vector.multi_reduction <add>, %69, %cst_23 [0] : vector<3x256xf32> to vector<256xf32>
    %71 = vector.shape_cast %70 : vector<256xf32> to vector<1x256xf32>
    %72 = vector.extract_strided_slice %5 {offsets = [3, 0], sizes = [3, 256], strides = [1, 1]} : vector<9x256xf32> to vector<3x256xf32>
    %73 = arith.mulf %65, %72 : vector<3x256xf32>
    %cst_24 = arith.constant dense<0.000000e+00> : vector<256xf32>
    %74 = vector.multi_reduction <add>, %73, %cst_24 [0] : vector<3x256xf32> to vector<256xf32>
    %75 = vector.shape_cast %74 : vector<256xf32> to vector<1x256xf32>
    %76 = arith.addf %71, %75 : vector<1x256xf32>
    %77 = vector.extract_strided_slice %5 {offsets = [6, 0], sizes = [3, 256], strides = [1, 1]} : vector<9x256xf32> to vector<3x256xf32>
    %78 = arith.mulf %67, %77 : vector<3x256xf32>
    %cst_25 = arith.constant dense<0.000000e+00> : vector<256xf32>
    %79 = vector.multi_reduction <add>, %78, %cst_25 [0] : vector<3x256xf32> to vector<256xf32>
    %80 = vector.shape_cast %79 : vector<256xf32> to vector<1x256xf32>
    %81 = arith.addf %76, %80 : vector<1x256xf32>
    %82 = vector.broadcast %6 : f32 to vector<1x256xf32>
    %83 = arith.addf %81, %82 : vector<1x256xf32>
    %84 = arith.negf %83 : vector<1x256xf32>
    %85 = math.exp %84 : vector<1x256xf32>
    %cst_26 = arith.constant 1.000000e+00 : f32
    %86 = vector.broadcast %cst_26 : f32 to vector<1x256xf32>
    %87 = arith.addf %86, %85 : vector<1x256xf32>
    %88 = arith.divf %86, %87 : vector<1x256xf32>
    %89 = vector.broadcast %88 : vector<1x256xf32> to vector<32x256xf32>
    %90 = arith.mulf %49, %89 : vector<32x256xf32>
    %c0_27 = arith.constant 0 : index
    %c0_28 = arith.constant 0 : index
    %c0_29 = arith.constant 0 : index
    %91 = vector.load %arg9[%c0_27, %c0_28, %c0_29] : memref<2x32x256xf32, #tpu.memory_space<vmem>>, vector<1x32x256xf32>
    %92 = vector.shape_cast %91 : vector<1x32x256xf32> to vector<32x256xf32>
    %93 = vector.shape_cast %90 : vector<32x256xf32> to vector<1x32x256xf32>
    tpu.vector_store %arg9[%c0_27, %c0_28, %c0_29], %93 {strides = array<i32>} : memref<2x32x256xf32, #tpu.memory_space<vmem>>, vector<1x32x256xf32>,
    %c1 = arith.constant 1 : index
    %c0_30 = arith.constant 0 : index
    %c0_31 = arith.constant 0 : index
    %94 = vector.load %arg1[%c1, %c0_30, %c0_31] : memref<2x32x256xf32, #tpu.memory_space<vmem>>, vector<1x32x256xf32>
    %95 = vector.shape_cast %94 : vector<1x32x256xf32> to vector<32x256xf32>
    %cst_32 = arith.constant dense<0.000000e+00> : vector<2x256xf32>
    %96 = tpu.matmul %0, %95, %cst_32 {dimension_numbers = #tpu.dot_dimension_numbers<[1], [0], [0], [1], [0, 0, 1, 1], [], []>} : vector<2x32xf32>, vector<32x256xf32>, vector<2x256xf32> -> vector<2x256xf32>
    %97 = vector.broadcast %1 : vector<2x1xf32> to vector<2x256xf32>
    %98 = arith.addf %96, %97 : vector<2x256xf32>
    %cst_33 = arith.constant 0.000000e+00 : f32
    %99 = vector.broadcast %cst_33 : f32 to vector<2x256xf32>
    %100 = arith.maximumf %98, %99 : vector<2x256xf32>
    %101 = vector.extract_strided_slice %2 {offsets = [0, 0], sizes = [32, 1], strides = [1, 1]} : vector<32x2xf32> to vector<32x1xf32>
    %102 = vector.extract_strided_slice %100 {offsets = [0, 0], sizes = [1, 256], strides = [1, 1]} : vector<2x256xf32> to vector<1x256xf32>
    %103 = vector.broadcast %101 : vector<32x1xf32> to vector<32x256xf32>
    %104 = vector.broadcast %102 : vector<1x256xf32> to vector<32x256xf32>
    %105 = arith.mulf %103, %104 : vector<32x256xf32>
    %106 = vector.broadcast %3 : vector<32x1xf32> to vector<32x256xf32>
    %107 = arith.addf %106, %105 : vector<32x256xf32>
    %108 = vector.extract_strided_slice %2 {offsets = [0, 1], sizes = [32, 1], strides = [1, 1]} : vector<32x2xf32> to vector<32x1xf32>
    %109 = vector.extract_strided_slice %100 {offsets = [1, 0], sizes = [1, 256], strides = [1, 1]} : vector<2x256xf32> to vector<1x256xf32>
    %110 = vector.broadcast %108 : vector<32x1xf32> to vector<32x256xf32>
    %111 = vector.broadcast %109 : vector<1x256xf32> to vector<32x256xf32>
    %112 = arith.mulf %110, %111 : vector<32x256xf32>
    %113 = arith.addf %107, %112 : vector<32x256xf32>
    %114 = arith.negf %113 : vector<32x256xf32>
    %115 = math.exp %114 : vector<32x256xf32>
    %cst_34 = arith.constant 1.000000e+00 : f32
    %116 = vector.broadcast %cst_34 : f32 to vector<32x256xf32>
    %117 = arith.addf %116, %115 : vector<32x256xf32>
    %118 = arith.divf %116, %117 : vector<32x256xf32>
    %119 = arith.mulf %95, %118 : vector<32x256xf32>
    %cst_35 = arith.constant dense<0.000000e+00> : vector<9x256xf32>
    %120 = tpu.matmul %4, %119, %cst_35 {dimension_numbers = #tpu.dot_dimension_numbers<[1], [0], [0], [1], [0, 0, 1, 1], [], []>} : vector<9x32xf32>, vector<32x256xf32>, vector<9x256xf32> -> vector<9x256xf32>
    %c255_i32_36 = arith.constant 255 : i32
    %121 = tpu.dynamic_rotate %120 by %c255_i32_36 dim 1 : vector<9x256xf32>, i32 -> vector<9x256xf32>
    %c1_i32_37 = arith.constant 1 : i32
    %122 = tpu.dynamic_rotate %120 by %c1_i32_37 dim 1 : vector<9x256xf32>, i32 -> vector<9x256xf32>
    %c2_i32_38 = arith.constant 2 : i32
    %123 = vector.broadcast %c2_i32_38 : i32 to vector<9x1xi32>
    %124 = arith.cmpi eq, %23, %123 : vector<9x1xi32>
    %c0_i32_39 = arith.constant 0 : i32
    %125 = vector.broadcast %c0_i32_39 : i32 to vector<9x1xi32>
    %126 = arith.cmpi eq, %23, %125 : vector<9x1xi32>
    %127 = vector.shape_cast %126 : vector<9x1xi1> to vector<9x1xi1>
    %128 = vector.broadcast %127 : vector<9x1xi1> to vector<9x256xi1>
    %129 = arith.select %128, %122, %120 : vector<9x256xi1>, vector<9x256xf32>
    %130 = vector.shape_cast %124 : vector<9x1xi1> to vector<9x1xi1>
    %131 = vector.broadcast %130 : vector<9x1xi1> to vector<9x256xi1>
    %132 = arith.select %131, %121, %129 : vector<9x256xi1>, vector<9x256xf32>
    %133 = vector.extract_strided_slice %132 {offsets = [0, 0], sizes = [3, 256], strides = [1, 1]} : vector<9x256xf32> to vector<3x256xf32>
    %c16_i32_40 = arith.constant 16 : i32
    %134 = tpu.dynamic_rotate %133 by %c16_i32_40 dim 1 : vector<3x256xf32>, i32 -> vector<3x256xf32>
    %135 = vector.extract_strided_slice %132 {offsets = [3, 0], sizes = [3, 256], strides = [1, 1]} : vector<9x256xf32> to vector<3x256xf32>
    %136 = vector.extract_strided_slice %132 {offsets = [6, 0], sizes = [3, 256], strides = [1, 1]} : vector<9x256xf32> to vector<3x256xf32>
    %c240_i32_41 = arith.constant 240 : i32
    %137 = tpu.dynamic_rotate %136 by %c240_i32_41 dim 1 : vector<3x256xf32>, i32 -> vector<3x256xf32>
    %138 = vector.extract_strided_slice %5 {offsets = [0, 0], sizes = [3, 256], strides = [1, 1]} : vector<9x256xf32> to vector<3x256xf32>
    %139 = arith.mulf %134, %138 : vector<3x256xf32>
    %cst_42 = arith.constant dense<0.000000e+00> : vector<256xf32>
    %140 = vector.multi_reduction <add>, %139, %cst_42 [0] : vector<3x256xf32> to vector<256xf32>
    %141 = vector.shape_cast %140 : vector<256xf32> to vector<1x256xf32>
    %142 = vector.extract_strided_slice %5 {offsets = [3, 0], sizes = [3, 256], strides = [1, 1]} : vector<9x256xf32> to vector<3x256xf32>
    %143 = arith.mulf %135, %142 : vector<3x256xf32>
    %cst_43 = arith.constant dense<0.000000e+00> : vector<256xf32>
    %144 = vector.multi_reduction <add>, %143, %cst_43 [0] : vector<3x256xf32> to vector<256xf32>
    %145 = vector.shape_cast %144 : vector<256xf32> to vector<1x256xf32>
    %146 = arith.addf %141, %145 : vector<1x256xf32>
    %147 = vector.extract_strided_slice %5 {offsets = [6, 0], sizes = [3, 256], strides = [1, 1]} : vector<9x256xf32> to vector<3x256xf32>
    %148 = arith.mulf %137, %147 : vector<3x256xf32>
    %cst_44 = arith.constant dense<0.000000e+00> : vector<256xf32>
    %149 = vector.multi_reduction <add>, %148, %cst_44 [0] : vector<3x256xf32> to vector<256xf32>
    %150 = vector.shape_cast %149 : vector<256xf32> to vector<1x256xf32>
    %151 = arith.addf %146, %150 : vector<1x256xf32>
    %152 = vector.broadcast %6 : f32 to vector<1x256xf32>
    %153 = arith.addf %151, %152 : vector<1x256xf32>
    %154 = arith.negf %153 : vector<1x256xf32>
    %155 = math.exp %154 : vector<1x256xf32>
    %cst_45 = arith.constant 1.000000e+00 : f32
    %156 = vector.broadcast %cst_45 : f32 to vector<1x256xf32>
    %157 = arith.addf %156, %155 : vector<1x256xf32>
    %158 = arith.divf %156, %157 : vector<1x256xf32>
    %159 = vector.broadcast %158 : vector<1x256xf32> to vector<32x256xf32>
    %160 = arith.mulf %119, %159 : vector<32x256xf32>
    %c1_46 = arith.constant 1 : index
    %c0_47 = arith.constant 0 : index
    %c0_48 = arith.constant 0 : index
    %161 = vector.load %arg9[%c1_46, %c0_47, %c0_48] : memref<2x32x256xf32, #tpu.memory_space<vmem>>, vector<1x32x256xf32>
    %162 = vector.shape_cast %161 : vector<1x32x256xf32> to vector<32x256xf32>
    %163 = vector.shape_cast %160 : vector<32x256xf32> to vector<1x32x256xf32>
    tpu.vector_store %arg9[%c1_46, %c0_47, %c0_48], %163 {strides = array<i32>} : memref<2x32x256xf32, #tpu.memory_space<vmem>>, vector<1x32x256xf32>,
    return
  }
  func.func @transform_0(%arg0: i32) -> (i32, i32, i32) {
    %c0_i32 = arith.constant 0 : i32
    %c0_i32_0 = arith.constant 0 : i32
    %c0_i32_1 = arith.constant 0 : i32
    return %arg0, %c0_i32, %c0_i32_0 : i32, i32, i32
  }
  func.func @transform_1(%arg0: i32) -> (i32, i32) {
    %c0_i32 = arith.constant 0 : i32
    %c0_i32_0 = arith.constant 0 : i32
    %c0_i32_1 = arith.constant 0 : i32
    return %c0_i32, %c0_i32_0 : i32, i32
  }
  func.func @transform_2(%arg0: i32) -> (i32, i32) {
    %c0_i32 = arith.constant 0 : i32
    %c0_i32_0 = arith.constant 0 : i32
    %c0_i32_1 = arith.constant 0 : i32
    return %c0_i32, %c0_i32_0 : i32, i32
  }
  func.func @transform_3(%arg0: i32) -> (i32, i32) {
    %c0_i32 = arith.constant 0 : i32
    %c0_i32_0 = arith.constant 0 : i32
    %c0_i32_1 = arith.constant 0 : i32
    return %c0_i32, %c0_i32_0 : i32, i32
  }
  func.func @transform_4(%arg0: i32) -> (i32, i32) {
    %c0_i32 = arith.constant 0 : i32
    %c0_i32_0 = arith.constant 0 : i32
    %c0_i32_1 = arith.constant 0 : i32
    return %c0_i32, %c0_i32_0 : i32, i32
  }
  func.func @transform_5(%arg0: i32) -> (i32, i32) {
    %c0_i32 = arith.constant 0 : i32
    %c0_i32_0 = arith.constant 0 : i32
    %c0_i32_1 = arith.constant 0 : i32
    return %c0_i32, %c0_i32_0 : i32, i32
  }
  func.func @transform_6(%arg0: i32) -> (i32, i32) {
    %c0_i32 = arith.constant 0 : i32
    %c0_i32_0 = arith.constant 0 : i32
    %c0_i32_1 = arith.constant 0 : i32
    return %c0_i32, %c0_i32_0 : i32, i32
  }
  func.func @transform_7(%arg0: i32) -> i32 {
    %c0_i32 = arith.constant 0 : i32
    %c0_i32_0 = arith.constant 0 : i32
    return %c0_i32 : i32
  }
  func.func @transform_8(%arg0: i32) -> (i32, i32, i32) {
    %c0_i32 = arith.constant 0 : i32
    %c0_i32_0 = arith.constant 0 : i32
    %c0_i32_1 = arith.constant 0 : i32
    return %arg0, %c0_i32, %c0_i32_0 : i32, i32, i32
  }
}

</mosaic_0001>

<bundles_post_ra>
// kernel: tpu_custom_call.1
= control target key start
LH: loop header
LB: loop body
LE: loop exit
PB: predicated region body
PF: predicated region fallthrough
CT: control target
= control target key end

     0   :  { %14 = vsyncpa [#allocation4], 0  ;;  %s1721_s0 = inlined_call_operand.hbm [shape: f32[2,32,256], index: 0, kind: input, shape index: {}]   ;;  %s1722_s1 = inlined_call_operand.vmem [shape: f32[2,32], index: 1, kind: input, shape index: {}]   ;;  %s1723_s2 = inlined_call_operand.vmem [shape: f32[2,1], index: 2, kind: input, shape index: {}]   ;;  %s1724_s3 = inlined_call_operand.vmem [shape: f32[32,2], index: 3, kind: input, shape index: {}]   ;;  %s1725_s4 = inlined_call_operand.vmem [shape: f32[32,1], index: 4, kind: input, shape index: {}]   ;;  %s1726_s5 = inlined_call_operand.vmem [shape: f32[9,32], index: 5, kind: input, shape index: {}]   ;;  %s1727_s6 = inlined_call_operand.vmem [shape: f32[9,256], index: 6, kind: input, shape index: {}]   ;;  %s1728_s7 = inlined_call_operand.<no memory space> [shape: f32[1], index: 7, kind: input, shape index: {}]   ;;  %s1729_s8 = inlined_call_operand.hbm [shape: f32[2,32,256], index: 8, kind: output, shape index: {}]  }
   0x1   :  { %15 = vsyncpa [#allocation5], 0  ;;  %s1201_s27 = smov [#allocation3]  }
   0x2   :  { %s21_s28 = sshll.u32 %s1201_s27, 4  ;;  %s22_s28 = int_to_ptr.vmem [resolvable:$true] %s21_s28 }
   0x3   :  { %s1165_s29 = scalar_lea.vmem %s22_s28, 2048  ;;  %p1170_p1 = scmp.lt.s32.totalorder %s22_s28, %s22_s28 }
   0x4   :  { %p1166_p0 = scmp.ne.s32.totalorder %s22_s28, %s1165_s29  ;;  %p1171_p2 = scmp.lt.s32.totalorder %s1165_s29, %s1165_s29 }
   0x6   :  { %p1172_p3 = por %p1171_p2, %p1170_p1 }
   0x8   :  { %p1173_p4 = pnand %p1172_p3, %p1166_p0 }
   0xa   :  { %1176 = shalt.err (!%p1173_p4)
}
   0xb   :  { %s1202_s30 = smov 256   ;;  %s1203_s9 = smov 16  }
   0xc   :  { %27 = dma.hbm_to_vmem [thread:$0]  %s1721_s0, 2048, %s22_s28, [#allocation4], %s1202_s30, %s1202_s30, %s1203_s9  }
   0xd   :  { %1197 = dma.done.wait [#allocation4], 2048  }
   0xe   :  { %1198 = vsyncadd [#allocation4], 4294965248  ;;  %v1204_v0 = vmov 0.0   ;;  %v1205_v1 = vmov 0   ;;  %v1266_v2 = vld [vmem:[#allocation3 + $0x38] sm:$0xff]  ;;  %v1268_v3 = vld [vmem:[#allocation3 + $0x30] sm:$0xff]  ;;  %v62_v34 = vlaneseq }
   0xf   :  { %178 = vmatprep.mubr.f32.mxu0 %v1204_v0  ;;  %1073 = vset.pattern.permute.xlu1 %v1205_v1  ;;  %v1270_v4 = vld [vmem:[#allocation3 + $0x28] sm:$0xff]  ;;  %v1273_v5 = vld [vmem:[#allocation3 + $0x20] sm:$0xff]  ;;  %v1276_v6 = vld [vmem:[#allocation3 + $0x18] sm:$0xff]  ;;  %vm110_vm0 = vcmask 261120   ;;  %v1206_v27 = vmov 1   ;;  %s1208_s11 = smov 1  }
  0x10   :  { %1072 = vset.pattern.permute.xlu0 %v1205_v1  ;;  %417 = vmatprep.mubr.f32.mxu1 %v1204_v0  ;;  %v1279_v7 = vld [vmem:[#allocation3 + $0x10] sm:$0xff]  ;;  %v1282_v8 = vld [vmem:[#allocation3 + $0x8] sm:$0xff]  ;;  %v1285_v9 = vld [vmem:[#allocation3] sm:$0xff]  ;;  %v1363_v37 = vshrl.u32 %v62_v34, 7  ;;  %vm489_vm13 = vcmask 1041408   ;;  %s1209_s0 = smov 112  }
  0x11   :  { %138 = vmatprep.subr.mxu0 %v1266_v2  ;;  %v49_v10 = vld [vmem:[%s1724_s3 + $0x10] sm:$0xff]  ;;  %v45_v11 = vld [vmem:[%s1722_s1] sm:$0x3]  ;;  %v1294_v12 = vld [vmem:[#allocation3 + $0x78] sm:$0xff]  ;;  %vm507_vm14 = vcmask 1042432  }
  0x12   :  { %139 = vmatpush1.msra.mxu0 %v1268_v3  ;;  %199 = vperm.xlu1 %1073, %v49_v10   ;;  %v46_v13 = vld [vmem:[%s1723_s2] sm:$0x3]  ;;  %v1300_v14 = vld [vmem:[#allocation3 + $0x70] sm:$0xff]  ;;  %v1303_v15 = vld [vmem:[#allocation3 + $0x68] sm:$0xff]  ;;  %v1369_v41 = vsub.s32 0, %v1363_v37  ;;  %v1372_v42 = vsub.s32 1, %v1363_v37 }
  0x13   :  { %140 = vmatprep.subr.mxu0 %v1270_v4  ;;  %107 = vperm.xlu0 %1072, %v46_v13   ;;  %v54_v16 = vld [vmem:[%s1725_s4 + $0x18] sm:$0xff]  ;;  %v1310_v17 = vld [vmem:[#allocation3 + $0x60] sm:$0xff]  ;;  %v1320_v20 = vld [vmem:[#allocation3 + $0x50] sm:$0xff] }
  0x14   :  { %141 = vmatpush1.msra.mxu0 %v1273_v5  ;;  %v50_v18 = vld [vmem:[%s1724_s3 + $0x18] sm:$0xff]  ;;  %v1323_v21 = vld [vmem:[#allocation3 + $0x48] sm:$0xff]  ;;  %v1329_v23 = vld [vmem:[#allocation3 + $0x40] sm:$0xff] }
  0x15   :  { %142 = vmatprep.subr.mxu0 %v1276_v6  ;;  %v1316_v19 = vld [vmem:[#allocation3 + $0x58] sm:$0xff]  ;;  %v48_v22 = vld [vmem:[%s1724_s3 + $0x8] sm:$0xff]  ;;  %v53_v25 = vld [vmem:[%s1725_s4 + $0x10] sm:$0xff] }
  0x16   :  { %143 = vmatpush1.msra.mxu0 %v1279_v7  ;;  %240 = vperm.xlu1 %1073, %v54_v16   ;;  %v52_v24 = vld [vmem:[%s1725_s4 + $0x8] sm:$0xff]  ;;  %v47_v26 = vld [vmem:[%s1724_s3] sm:$0xff] }
  0x17   :  { %144 = vmatprep.subr.mxu0 %v1282_v8  ;;  %204 = vperm.xlu0 %1072, %v50_v18   ;;  %v51_v28 = vld [vmem:[%s1725_s4] sm:$0xff] }
  0x18   :  { %145 = vmatpush1.msra.mxu0 %v1285_v9 }
  0x19   :  { %1032 = vmatmul.mubr.msk.f32.vlgmr.msra.gmra.mxu0 %vm110_vm0, %v45_v11  ;;  %640 = vmatprep.subr.mxu0 %v1294_v12 }
  0x1a   :  { %641 = vmatpush1.msra.mxu0 %v1300_v14  ;;  %680 = vmatprep.mubr.f32.mxu0 %v1204_v0 }
  0x1b   :  { %642 = vmatprep.subr.mxu0 %v1303_v15  ;;  %194 = vperm.xlu1 %1073, %v48_v22  }
  0x1c   :  { %643 = vmatpush1.msra.mxu0 %v1310_v17  ;;  %230 = vperm.xlu0 %1072, %v52_v24  }
  0x1d   :  { %644 = vmatprep.subr.mxu0 %v1316_v19 }
  0x1e   :  { %645 = vmatpush1.msra.mxu0 %v1320_v20 }
  0x1f   :  { %646 = vmatprep.subr.mxu0 %v1323_v21  ;;  %235 = vperm.xlu1 %1073, %v53_v25  }
  0x20   :  { %647 = vmatpush1.msra.mxu0 %v1329_v23  ;;  %1074 = vset.pattern.permute.xlu0 %v1206_v27 }
  0x21   :  { %1045 = vmatmul.mubr.msk.f32.vlgmr.msra.gmra.mxu0 %vm110_vm0, %v45_v11  ;;  %264 = vperm.xlu0 %1074, %v50_v18  }
  0x23   :  { %189 = vperm.xlu1 %1073, %v47_v26  }
  0x25   :  { %260 = vperm.xlu0 %1074, %v49_v10  }
  0x27   :  { %1075 = vset.pattern.permute.xlu1 %v1206_v27 }
  0x28   :  { %256 = vperm.xlu1 %1075, %v48_v22  }
  0x29   :  { %252 = vperm.xlu0 %1074, %v47_v26  }
  0x2c   :  { %1076 = vset.pattern.permute.xlu1 %v1205_v1 }
  0x2d   :  { %225 = vperm.xlu1 %1076, %v51_v28  }
  0x8d   :  { %v1348_v29 = vpop.permute.xlu1 %199 }
  0x8e   :  { %v1350_v30 = vpop.permute.xlu0 %107 }
  0x91   :  { %v1352_v31 = vpop.permute.xlu1 %240 }
  0x92   :  { %v1354_v32 = vpop.permute.xlu0 %204 }
  0x96   :  { %v1356_v33 = vpop.permute.xlu1 %194 }
  0x97   :  { %v1358_v35 = vpop.permute.xlu0 %230 }
  0x9a   :  { %v1360_v36 = vpop.permute.xlu1 %235 }
  0x9c   :  { %v1365_v38 = vpop.permute.xlu0 %264 }
  0x9e   :  { %v1374_v43 = vpop.permute.xlu1 %189 }
  0xa0   :  { %v1379_v50 = vpop.permute.xlu0 %260 }
  0xa3   :  { %v1381_v51 = vpop.permute.xlu1 %256 }
  0xd9   :  { %v180_v39 = vpop.f32.mrf.mxu0 }
  0xda   :  { %v181_v40 = vadd.f32 %v180_v39, %v1350_v30  ;;  %v1403_v39 = vpop.permute.xlu0 %252 }
  0xdb   :  { %v182_v44 = vpop.f32.mrf.mxu0 }
  0xdc   :  { %v185_v45 = vmax.f32 %v181_v40, 0.0  ;;  %v183_v46 = vadd.f32 %v182_v44, %v1350_v30  ;;  %v226_v40 = vpop.permute.xlu1 %225 }
  0xde   :  { %v210_v47 = vrot.slane %v185_v45, %v1369_v41  ;;  %v270_v48 = vrot.slane %v185_v45, %v1372_v42  ;;  %v186_v49 = vmax.f32 %v183_v46, 0.0 }
  0xe0   :  { %v217_v52 = vmul.f32 %v210_v47, %v1356_v33  ;;  %v219_v53 = vmul.f32 %v210_v47, %v1348_v29  ;;  %v221_v54 = vmul.f32 %v210_v47, %v1354_v32  ;;  %v281_v55 = vmul.f32 %v270_v48, %v1365_v38 }
  0xe1   :  { %v279_v56 = vmul.f32 %v270_v48, %v1379_v50  ;;  %v214_v57 = vrot.slane %v186_v49, %v1369_v41  ;;  %v274_v58 = vrot.slane %v186_v49, %v1372_v42  ;;  %v277_v62 = vmul.f32 %v270_v48, %v1381_v51  ;;  %v682_v24 = vpop.f32.mrf.mxu0 }
  0xe2   :  { %v249_v59 = vadd.f32 %v1352_v31, %v221_v54  ;;  %v247_v60 = vadd.f32 %v1360_v36, %v219_v53  ;;  %v245_v61 = vadd.f32 %v1358_v35, %v217_v52  ;;  %v215_v46 = vmul.f32 %v210_v47, %v1374_v43 }
  0xe3   :  { %v218_v63 = vmul.f32 %v214_v57, %v1356_v33  ;;  %v220_v1 = vmul.f32 %v214_v57, %v1348_v29  ;;  %v222_v10 = vmul.f32 %v214_v57, %v1354_v32  ;;  %v280_v11 = vmul.f32 %v274_v58, %v1379_v50 }
  0xe4   :  { %v289_v13 = vadd.f32 %v281_v55, %v249_v59  ;;  %v287_v16 = vadd.f32 %v279_v56, %v247_v60  ;;  %v282_v18 = vmul.f32 %v274_v58, %v1365_v38  ;;  %v278_v22 = vmul.f32 %v274_v58, %v1381_v51 }
  0xe5   :  { %v248_v25 = vadd.f32 %v1360_v36, %v220_v1  ;;  %v250_v26 = vadd.f32 %v1352_v31, %v222_v10  ;;  %v246_v27 = vadd.f32 %v1358_v35, %v218_v63  ;;  %v285_v28 = vadd.f32 %v277_v62, %v245_v61  ;;  %v684_v63 = vpop.f32.mrf.mxu0 }
  0xe6   :  { %v1039_v44 = vmul.f32 -1.442695, %v289_v13  ;;  %v1037_v45 = vmul.f32 -1.442695, %v287_v16  ;;  %v275_v55 = vmul.f32 %v270_v48, %v1403_v39  ;;  %v216_v56 = vmul.f32 %v214_v57, %v1374_v43 }
  0xe7   :  { %v288_v49 = vadd.f32 %v280_v11, %v248_v25  ;;  %v290_v52 = vadd.f32 %v282_v18, %v250_v26  ;;  %v286_v53 = vadd.f32 %v278_v22, %v246_v27  ;;  %v1035_v54 = vmul.f32 -1.442695, %v285_v28 }
  0xe8   :  { %v243_v59 = vadd.f32 %v226_v40, %v215_v46  ;;  %v683_v60 = vadd.f32 %v682_v24, %v1350_v30  ;;  %1077 = vpow2.f32 %v1037_v45  ;;  %v276_v1 = vmul.f32 %v274_v58, %v1403_v39 }
  0xe9   :  { %v1038_v61 = vmul.f32 -1.442695, %v288_v49  ;;  %v1036_v62 = vmul.f32 -1.442695, %v286_v53  ;;  %1079 = vpow2.f32 %v1039_v44  ;;  %v1040_v10 = vmul.f32 -1.442695, %v290_v52 }
  0xea   :  { %v244_v47 = vadd.f32 %v226_v40, %v216_v56  ;;  %v687_v11 = vmax.f32 %v683_v60, 0.0  ;;  %1081 = vpow2.f32 %v1035_v54  ;;  %v283_v13 = vadd.f32 %v275_v55, %v243_v59 }
  0xeb   :  { %v685_v16 = vadd.f32 %v684_v63, %v1350_v30  ;;  %1083 = vpow2.f32 %v1038_v61 }
  0xec   :  { %v284_v48 = vadd.f32 %v276_v1, %v244_v47  ;;  %v692_v57 = vrot.slane %v687_v11, %v1369_v41  ;;  %1085 = vpow2.f32 %v1036_v62  ;;  %v716_v18 = vrot.slane %v687_v11, %v1372_v42 }
  0xed   :  { %v688_v22 = vmax.f32 %v685_v16, 0.0  ;;  %1087 = vpow2.f32 %v1040_v10  ;;  %v1033_v25 = vmul.f32 -1.442695, %v283_v13 }
  0xee   :  { %v697_v24 = vmul.f32 %v692_v57, %v1374_v43  ;;  %v699_v58 = vmul.f32 %v692_v57, %v1356_v33  ;;  %v1034_v26 = vmul.f32 -1.442695, %v284_v48  ;;  %v701_v27 = vmul.f32 %v692_v57, %v1348_v29 }
  0xef   :  { %v703_v28 = vmul.f32 %v692_v57, %v1354_v32  ;;  %v721_v45 = vmul.f32 %v716_v18, %v1403_v39  ;;  %v723_v46 = vmul.f32 %v716_v18, %v1381_v51  ;;  %v725_v53 = vmul.f32 %v716_v18, %v1379_v50 }
  0xf0   :  { %v705_v30 = vadd.f32 %v697_v24, %v226_v40  ;;  %v707_v44 = vadd.f32 %v699_v58, %v1358_v35  ;;  %v709_v49 = vadd.f32 %v701_v27, %v1360_v36  ;;  %v696_v54 = vrot.slane %v688_v22, %v1369_v41 }
  0xf1   :  { %v711_v52 = vadd.f32 %v703_v28, %v1352_v31  ;;  %v727_v55 = vmul.f32 %v716_v18, %v1365_v38  ;;  %v720_v60 = vrot.slane %v688_v22, %v1372_v42  ;;  %1089 = vpow2.f32 %v1034_v26 }
  0xf2   :  { %v729_v56 = vadd.f32 %v721_v45, %v705_v30  ;;  %v731_v59 = vadd.f32 %v723_v46, %v707_v44  ;;  %v733_v63 = vadd.f32 %v725_v53, %v709_v49  ;;  %v698_v61 = vmul.f32 %v696_v54, %v1374_v43 }
  0xf3   :  { %v700_v62 = vmul.f32 %v696_v54, %v1356_v33  ;;  %1091 = vpow2.f32 %v1033_v25  ;;  %v735_v1 = vadd.f32 %v727_v55, %v711_v52  ;;  %v702_v10 = vmul.f32 %v696_v54, %v1348_v29 }
  0xf4   :  { %v704_v47 = vmul.f32 %v696_v54, %v1354_v32  ;;  %v1046_v11 = vmul.f32 -1.442695, %v729_v56  ;;  %v706_v41 = vadd.f32 %v698_v61, %v226_v40  ;;  %v1048_v48 = vmul.f32 -1.442695, %v731_v59 }
  0xf5   :  { %v708_v13 = vadd.f32 %v700_v62, %v1358_v35  ;;  %v1078_v16 = vpop.eup %1077  ;;  %v710_v42 = vadd.f32 %v702_v10, %v1360_v36  ;;  %v722_v43 = vmul.f32 %v720_v60, %v1403_v39  ;;  %v1050_v33 = vmul.f32 -1.442695, %v733_v63 }
  0xf6   :  { %v712_v57 = vadd.f32 %v704_v47, %v1352_v31  ;;  %v1080_v18 = vpop.eup %1079  ;;  %v724_v22 = vmul.f32 %v720_v60, %v1381_v51  ;;  %v726_v29 = vmul.f32 %v720_v60, %v1379_v50  ;;  %v1052_v32 = vmul.f32 -1.442695, %v735_v1 }
  0xf7   :  { %v1082_v24 = vpop.eup %1081  ;;  %v728_v40 = vmul.f32 %v720_v60, %v1365_v38  ;;  %v730_v58 = vadd.f32 %v722_v43, %v706_v41  ;;  %v319_v25 = vadd.f32 1.0, %v1078_v16  ;;  %1093 = vpow2.f32 %v1046_v11 }
  0xf8   :  { %v1084_v35 = vpop.eup %1083  ;;  %v732_v26 = vadd.f32 %v724_v22, %v708_v13  ;;  %v734_v36 = vadd.f32 %v726_v29, %v710_v42  ;;  %1095 = vpow2.f32 %v1048_v48  ;;  %v321_v46 = vadd.f32 1.0, %v1080_v18 }
  0xf9   :  { %v1086_v27 = vpop.eup %1085  ;;  %v736_v31 = vadd.f32 %v728_v40, %v712_v57  ;;  %v1047_v39 = vmul.f32 -1.442695, %v730_v58  ;;  %1097 = vpow2.f32 %v1050_v33  ;;  %v320_v52 = vadd.f32 1.0, %v1084_v35 }
  0xfa   :  { %v1088_v28 = vpop.eup %1087  ;;  %v318_v30 = vadd.f32 1.0, %v1086_v27  ;;  %1099 = vpow2.f32 %v1052_v32  ;;  %v1049_v51 = vmul.f32 -1.442695, %v732_v26  ;;  %v1051_v50 = vmul.f32 -1.442695, %v734_v36 }
  0xfb   :  { %1101 = vrcp.f32 %v319_v25  ;;  %v1053_v44 = vmul.f32 -1.442695, %v736_v31  ;;  %v322_v38 = vadd.f32 1.0, %v1088_v28  ;;  %v317_v53 = vadd.f32 1.0, %v1082_v24 }
  0xfc   :  { %1103 = vpow2.f32 %v1047_v39 }
  0xfd   :  { %1105 = vrcp.f32 %v318_v30 }
  0xfe   :  { %v1090_v45 = vpop.eup %1089  ;;  %1107 = vpow2.f32 %v1049_v51 }
  0xff   :  { %1109 = vpow2.f32 %v1051_v50  ;;  %v316_v54 = vadd.f32 1.0, %v1090_v45 }
 0x100   :  { %v1092_v49 = vpop.eup %1091  ;;  %1111 = vpow2.f32 %v1053_v44 }
 0x101   :  { %1113 = vrcp.f32 %v322_v38  ;;  %v315_v55 = vadd.f32 1.0, %v1092_v49 }
 0x102   :  { %1115 = vrcp.f32 %v321_v46 }
 0x103   :  { %1117 = vrcp.f32 %v320_v52 }
 0x104   :  { %v1094_v56 = vpop.eup %1093  ;;  %1119 = vrcp.f32 %v317_v53  ;;  %v1539_v52 = vmul.u32.u64.low 2863311531, %v1363_v37  ;;  %v1540_v53 = vmul.u32.u64.high 2863311531, %v1363_v37, %v1539_v52 }
 0x105   :  { %v1096_v59 = vpop.eup %1095  ;;  %1121 = vrcp.f32 %v316_v54  ;;  %v761_v40 = vadd.f32 1.0, %v1094_v56  ;;  %v64_v54 = vadd.s32 8, %v1363_v37 }
 0x106   :  { %v1098_v60 = vpop.eup %1097  ;;  %1123 = vrcp.f32 %v315_v55  ;;  %v763_v18 = vadd.f32 1.0, %v1096_v59  ;;  %v71_v55 = vshrl.u32 %v1540_v53, 1 }
 0x107   :  { %v1100_v63 = vpop.eup %1099  ;;  %v765_v13 = vadd.f32 1.0, %v1098_v60  ;;  %v1544_v56 = vmul.u32.u64.low 2863311531, %v64_v54  ;;  %v1545_v59 = vmul.u32.u64.high 2863311531, %v64_v54, %v1544_v56 }
 0x108   :  { %v1102_v61 = vpop.eup %1101  ;;  %v767_v10 = vadd.f32 1.0, %v1100_v63  ;;  %v72_v60 = vmul.u32 3, %v71_v55 }
 0x109   :  { %v1104_v62 = vpop.eup %1103 }
 0x10a   :  { %v1106_v1 = vpop.eup %1105  ;;  %1125 = vrcp.f32 %v767_v10  ;;  %v762_v29 = vadd.f32 1.0, %v1104_v62  ;;  %v73_v63 = vsub.s32 %v1363_v37, %v72_v60 }
 0x10b   :  { %v1108_v47 = vpop.eup %1107 }
 0x10c   :  { %v1110_v11 = vpop.eup %1109  ;;  %v764_v42 = vadd.f32 1.0, %v1108_v47  ;;  %vm87_vm1 = vcmp.ne.s32.totalorder %v73_v63, 0  ;;  %vm89_vm2 = vcmp.lt.s32.totalorder %v73_v63, 0  ;;  %v93_v10 = vadd.s32 3, %v73_v63 }
 0x10d   :  { %v1112_v41 = vpop.eup %1111  ;;  %v766_v16 = vadd.f32 1.0, %v1110_v11  ;;  %vm91_vm3 = vmand %vm89_vm2, %vm87_vm1 }
 0x10e   :  { %v1114_v48 = vpop.eup %1113  ;;  %v768_v57 = vadd.f32 1.0, %v1112_v41 }
 0x10f   :  { %v1116_v43 = vpop.eup %1115  ;;  %v1438_v33 = vmul.f32 %v1114_v48, %v1266_v2  ;;  %1127 = vrcp.f32 %v766_v16  ;;  %v1449_v2 = vmul.f32 %v1102_v61, %v1273_v5  ;;  %v82_v61 = vshrl.u32 %v1545_v59, 1 }
 0x110   :  { %v1118_v22 = vpop.eup %1117  ;;  %v1441_v24 = vmul.f32 %v1116_v43, %v1268_v3  ;;  %1129 = vrcp.f32 %v768_v57  ;;  %v1453_v3 = vmul.f32 %v1106_v1, %v1276_v6  ;;  %v55_v6 = vld [vmem:[%s1726_s5] sm:$0xff]  ;;  %v1550_v1 = vand.u32 127, %v62_v34 }
 0x111   :  { %v1120_v32 = vpop.eup %1119  ;;  %1131 = vrcp.f32 %v765_v13  ;;  %377 = vmatprep.subr.mxu1 %v1438_v33  ;;  %v1445_v58 = vmul.f32 %v1118_v22, %v1270_v4  ;;  %v83_v62 = vmul.u32 3, %v82_v61  ;;  %v95_v13 = vsel %vm91_vm3, %v93_v10, %v73_v63 }
 0x112   :  { %v1122_v35 = vpop.eup %1121  ;;  %378 = vmatpush1.msra.mxu1 %v1441_v24  ;;  %1133 = vrcp.f32 %v764_v42  ;;  %v1457_v26 = vmul.f32 %v1120_v32, %v1279_v7  ;;  %v56_v7 = vld [vmem:[%s1726_s5 + $0x8] sm:$0x1]  ;;  %s1207_s5 = smov 127   ;;  %vm453_vm4 = vcmp.lt.s32.totalorder %v1550_v1, 1  ;;  %vm440_vm7 = vcmp.lt.s32.totalorder %v1550_v1, 127 }
 0x113   :  { %v1124_v25 = vpop.eup %1123  ;;  %1135 = vrcp.f32 %v763_v18  ;;  %379 = vmatprep.subr.mxu1 %v1445_v58  ;;  %v1461_v4 = vmul.f32 %v1122_v35, %v1282_v8  ;;  %v84_v41 = vsub.s32 %v64_v54, %v83_v62  ;;  %vm460_vm8 = vcmp.eq.s32.totalorder %v95_v13, 0 }
 0x114   :  { %380 = vmatpush1.msra.mxu1 %v1449_v2  ;;  %1137 = vrcp.f32 %v762_v29  ;;  %v1465_v5 = vmul.f32 %v1124_v25, %v1285_v9  ;;  %vm458_vm9 = vcmp.eq.s32.totalorder %v95_v13, 2  ;;  %vm482_vm15 = vcmp.lt.s32.totalorder %v1550_v1, 16 }
 0x115   :  { %1139 = vrcp.f32 %v761_v40  ;;  %381 = vmatprep.subr.mxu1 %v1453_v3  ;;  %vm88_vm5 = vcmp.ne.s32.totalorder %v84_v41, 0  ;;  %vm90_vm6 = vcmp.lt.s32.totalorder %v84_v41, 0  ;;  %v94_v34 = vadd.s32 3, %v84_v41 }
 0x116   :  { %382 = vmatpush1.msra.mxu1 %v1457_v26  ;;  %vm92_vm10 = vmand %vm90_vm6, %vm88_vm5 }
 0x117   :  { %383 = vmatprep.subr.mxu1 %v1461_v4  ;;  %v1126_v8 = vpop.eup %1125  ;;  %v96_v25 = vsel %vm92_vm10, %v94_v34, %v84_v41 }
 0x118   :  { %384 = vmatpush1.msra.mxu1 %v1465_v5  ;;  %v1483_v28 = vmul.f32 %v1126_v8, %v1300_v14  ;;  %vm461_vm11 = vcmp.eq.s32.totalorder %v96_v25, 0  ;;  %vm459_vm12 = vcmp.eq.s32.totalorder %v96_v25, 2  ;;  %v1636_v25 = vld [vmem:[%s1727_s6 + $0x8] sm:$0xff] }
 0x119   :  { %1041 = vmatmul.mubr.msk.f32.vlgmr.msra.gmra.mxu1 %vm110_vm0, %v55_v6 }
 0x11a   :  { %423 = vmatprep.mubr.f32.mxu1 %v1204_v0 }
 0x11c   :  { %v1128_v36 = vpop.eup %1127 }
 0x11d   :  { %v1130_v9 = vpop.eup %1129  ;;  %1042 = vmatmul.mubr.msk.f32.gmra.mxu1 %vm110_vm0, %v56_v7  ;;  %v1487_v51 = vmul.f32 %v1128_v36, %v1303_v15 }
 0x11e   :  { %v1132_v27 = vpop.eup %1131  ;;  %v1479_v31 = vmul.f32 %v1130_v9, %v1294_v12  ;;  %857 = vmatprep.mubr.f32.mxu1 %v1204_v0 }
 0x11f   :  { %v1134_v39 = vpop.eup %1133  ;;  %v1491_v44 = vmul.f32 %v1132_v27, %v1310_v17 }
 0x120   :  { %v1136_v30 = vpop.eup %1135  ;;  %817 = vmatprep.subr.mxu1 %v1479_v31  ;;  %v1495_v38 = vmul.f32 %v1134_v39, %v1316_v19 }
 0x121   :  { %v1138_v50 = vpop.eup %1137  ;;  %818 = vmatpush1.msra.mxu1 %v1483_v28  ;;  %v1499_v14 = vmul.f32 %v1136_v30, %v1320_v20 }
 0x122   :  { %v1140_v12 = vpop.eup %1139  ;;  %819 = vmatprep.subr.mxu1 %v1487_v51  ;;  %v1503_v15 = vmul.f32 %v1138_v50, %v1323_v21 }
 0x123   :  { %820 = vmatpush1.msra.mxu1 %v1491_v44  ;;  %v1507_v17 = vmul.f32 %v1140_v12, %v1329_v23 }
 0x124   :  { %821 = vmatprep.subr.mxu1 %v1495_v38 }
 0x125   :  { %822 = vmatpush1.msra.mxu1 %v1499_v14 }
 0x126   :  { %823 = vmatprep.subr.mxu1 %v1503_v15 }
 0x127   :  { %824 = vmatpush1.msra.mxu1 %v1507_v17 }
 0x128   :  { %1054 = vmatmul.mubr.msk.f32.vlgmr.msra.gmra.mxu1 %vm110_vm0, %v55_v6 }
 0x129   :  { %863 = vmatprep.mubr.f32.mxu1 %v1204_v0 }
 0x12c   :  { %1055 = vmatmul.mubr.msk.f32.gmra.mxu1 %vm110_vm0, %v56_v7  ;;  %vm502_vm0 = vcmp.lt.s32.totalorder %v1550_v1, 112 }
 0x1d9   :  { %v419_v19 = vpop.f32.mrf.mxu1 }
 0x1da   :  { %430 = vrot.lane.b32.xlu0 %v419_v19, %s1207_s5  ;;  %445 = vrot.lane.b32.xlu1 %v419_v19, %s1208_s11 }
 0x1db   :  { %v421_v20 = vpop.f32.mrf.mxu1 }
 0x1dd   :  { %v1514_v21 = vpop.f32.mrf.mxu1 }
 0x1de   :  { %449 = vrot.lane.b32.xlu0 %v421_v20, %s1208_s11  ;;  %447 = vrot.lane.b32.xlu1 %v1514_v21, %s1208_s11 }
 0x1df   :  { %v1518_v23 = vpop.f32.mrf.mxu1 }
 0x1e2   :  { %434 = vrot.lane.b32.xlu0 %v421_v20, %s1207_s5  ;;  %432 = vrot.lane.b32.xlu1 %v1514_v21, %s1207_s5 }
 0x1e6   :  { %451 = vrot.lane.b32.xlu1 %v1518_v23, %s1208_s11 }
 0x1e8   :  { %v1521_v0 = vpop.f32.mrf.mxu1 }
 0x1e9   :  { %882 = vrot.lane.b32.xlu0 %v1521_v0, %s1208_s11 }
 0x1ea   :  { %v1524_v45 = vpop.f32.mrf.mxu1  ;;  %436 = vrot.lane.b32.xlu1 %v1518_v23, %s1207_s5 }
 0x1ec   :  { %v1528_v46 = vpop.f32.mrf.mxu1 }
 0x1ed   :  { %870 = vrot.lane.b32.xlu0 %v1521_v0, %s1207_s5 }
 0x1ee   :  { %884 = vrot.lane.b32.xlu1 %v1528_v46, %s1208_s11  ;;  %v1533_v49 = vpop.f32.mrf.mxu1 }
 0x1f1   :  { %886 = vrot.lane.b32.xlu0 %v1524_v45, %s1208_s11 }
 0x1f2   :  { %872 = vrot.lane.b32.xlu1 %v1528_v46, %s1207_s5 }
 0x1f5   :  { %874 = vrot.lane.b32.xlu0 %v1524_v45, %s1207_s5 }
 0x1f6   :  { %888 = vrot.lane.b32.xlu1 %v1533_v49, %s1208_s11 }
 0x1fa   :  { %876 = vrot.lane.b32.xlu1 %v1533_v49, %s1207_s5 }
 0x24c   :  { %v431_v47 = vpop.permute.xlu0 %430  ;;  %v446_v11 = vpop.permute.xlu1 %445 }
 0x250   :  { %v450_v16 = vpop.permute.xlu0 %449  ;;  %v448_v48 = vpop.permute.xlu1 %447 }
 0x251   :  { %v454_v37 = vsel %vm453_vm4, %v446_v11, %v450_v16  ;;  %v456_v42 = vsel %vm453_vm4, %v450_v16, %v446_v11 }
 0x252   :  { %v466_v29 = vsel %vm460_vm8, %v456_v42, %v419_v19  ;;  %v467_v32 = vsel %vm460_vm8, %v454_v37, %v421_v20 }
 0x254   :  { %v435_v57 = vpop.permute.xlu0 %434  ;;  %v433_v43 = vpop.permute.xlu1 %432 }
 0x255   :  { %v441_v18 = vsel %vm440_vm7, %v431_v47, %v435_v57  ;;  %v443_v22 = vsel %vm440_vm7, %v435_v57, %v431_v47 }
 0x256   :  { %v1565_v40 = vsel %vm458_vm9, %v441_v18, %v466_v29  ;;  %v1568_v35 = vsel %vm458_vm9, %v443_v22, %v467_v32 }
 0x257   :  { %478 = vrot.lane.b32.xlu0 %v1565_v40, %s1203_s9  ;;  %480 = vrot.lane.b32.xlu1 %v1568_v35, %s1203_s9  ;;  %v490_v20 = vrot.slane %v1565_v40, 6  ;;  %v493_v52 = vrot.slane %v1568_v35, 6 }
 0x258   :  { %v452_v6 = vpop.permute.xlu1 %451 }
 0x259   :  { %v455_v7 = vsel %vm453_vm4, %v448_v48, %v452_v6  ;;  %v457_v8 = vsel %vm453_vm4, %v452_v6, %v448_v48 }
 0x25a   :  { %v468_v27 = vsel %vm461_vm11, %v457_v8, %v1514_v21  ;;  %v469_v39 = vsel %vm461_vm11, %v455_v7, %v1518_v23 }
 0x25b   :  { %v883_v36 = vpop.permute.xlu0 %882 }
 0x25c   :  { %v437_v9 = vpop.permute.xlu1 %436 }
 0x25d   :  { %v442_v30 = vsel %vm440_vm7, %v433_v43, %v437_v9  ;;  %v444_v50 = vsel %vm440_vm7, %v437_v9, %v433_v43  ;;  %v523_v9 = vmul.f32 %v1568_v35, %v1636_v25 }
 0x25e   :  { %v476_v12 = vsel %vm459_vm12, %v442_v30, %v468_v27  ;;  %v477_v19 = vsel %vm459_vm12, %v444_v50, %v469_v39 }
 0x25f   :  { %v491_v53 = vrot.slane %v476_v12, 6  ;;  %v494_v21 = vrot.slane %v477_v19, 6  ;;  %v871_v54 = vpop.permute.xlu0 %870  ;;  %v527_v39 = vrot.slane %v523_v9, 3 }
 0x260   :  { %v885_v55 = vpop.permute.xlu1 %884 }
 0x261   :  { %v492_v23 = vsel %vm489_vm13, %v490_v20, %v491_v53  ;;  %v495_v56 = vsel %vm489_vm13, %v493_v52, %v494_v21  ;;  %v537_v50 = vsel %vm507_vm14, %v527_v39, 0.0 }
 0x262   :  { %498 = vrot.lane.b32.xlu0 %v492_v23, %s1209_s0  ;;  %500 = vrot.lane.b32.xlu1 %v495_v56, %s1209_s0  ;;  %v538_v21 = vrot.slane %v537_v50, 4 }
 0x263   :  { %v887_v59 = vpop.permute.xlu0 %886 }
 0x264   :  { %v873_v60 = vpop.permute.xlu1 %872  ;;  %v890_v63 = vsel %vm453_vm4, %v883_v36, %v887_v59  ;;  %v892_v61 = vsel %vm453_vm4, %v887_v59, %v883_v36 }
 0x265   :  { %v894_v11 = vsel %vm460_vm8, %v892_v61, %v1521_v0  ;;  %v895_v41 = vsel %vm460_vm8, %v890_v63, %v1524_v45 }
 0x267   :  { %v875_v62 = vpop.permute.xlu0 %874 }
 0x268   :  { %v878_v10 = vsel %vm440_vm7, %v871_v54, %v875_v62  ;;  %v880_v47 = vsel %vm440_vm7, %v875_v62, %v871_v54  ;;  %v889_v16 = vpop.permute.xlu1 %888  ;;  %v59_v54 = vld [vmem:[%s1727_s6 + $0x10] sm:$0x1] }
 0x269   :  { %v898_v48 = vsel %vm458_vm9, %v878_v10, %v894_v11  ;;  %v899_v37 = vsel %vm458_vm9, %v880_v47, %v895_v41  ;;  %v891_v42 = vsel %vm453_vm4, %v885_v55, %v889_v16  ;;  %v893_v34 = vsel %vm453_vm4, %v889_v16, %v885_v55  ;;  %v60_v55 = vld [vmem:[%s1727_s6 + $0x18] sm:$0x1] }
 0x26a   :  { %902 = vrot.lane.b32.xlu0 %v898_v48, %s1203_s9  ;;  %904 = vrot.lane.b32.xlu1 %v899_v37, %s1203_s9  ;;  %v896_v0 = vsel %vm461_vm11, %v893_v34, %v1528_v46  ;;  %v897_v45 = vsel %vm461_vm11, %v891_v42, %v1533_v49  ;;  %v912_v29 = vrot.slane %v898_v48, 6  ;;  %v915_v32 = vrot.slane %v899_v37, 6  ;;  %v1631_v49 = vld [vmem:[%s1727_s6] sm:$0xff] }
 0x26b   :  { %v522_v36 = vmul.f32 %v1565_v40, %v1631_v49  ;;  %v550_v63 = vrot.slane %v1631_v49, 6  ;;  %v551_v62 = vrot.slane %v59_v54, 6  ;;  %v553_v10 = vrot.slane %v1636_v25, 6 }
 0x26c   :  { %v877_v57 = vpop.permute.xlu1 %876  ;;  %v554_v47 = vrot.slane %v60_v55, 6  ;;  %v539_v11 = vadd.f32 %v538_v21, %v537_v50  ;;  %v942_v42 = vmul.f32 %v898_v48, %v1631_v49 }
 0x26d   :  { %v879_v13 = vsel %vm440_vm7, %v873_v60, %v877_v57  ;;  %v881_v43 = vsel %vm440_vm7, %v877_v57, %v873_v60  ;;  %v526_v27 = vrot.slane %v522_v36, 3 }
 0x26e   :  { %v900_v18 = vsel %vm459_vm12, %v879_v13, %v896_v0  ;;  %v901_v22 = vsel %vm459_vm12, %v881_v43, %v897_v45  ;;  %v1664_v45 = vsel %vm489_vm13, %v550_v63, %v551_v62  ;;  %v1667_v13 = vsel %vm489_vm13, %v553_v10, %v554_v47 }
 0x26f   :  { %v913_v6 = vrot.slane %v900_v18, 6  ;;  %v916_v7 = vrot.slane %v901_v22, 6  ;;  %v530_v30 = vsel %vm507_vm14, %v526_v27, 0.0  ;;  %v540_v43 = vrot.slane %v539_v11, 2 }
 0x270   :  { %v531_v52 = vrot.slane %v530_v30, 4  ;;  %v943_v18 = vmul.f32 %v899_v37, %v1636_v25 }
 0x271   :  { %v917_v8 = vsel %vm489_vm13, %v915_v32, %v916_v7  ;;  %v914_v46 = vsel %vm489_vm13, %v912_v29, %v913_v6  ;;  %v946_v32 = vrot.slane %v942_v42, 3  ;;  %v541_v27 = vadd.f32 %v540_v43, %v539_v11 }
 0x272   :  { %922 = vrot.lane.b32.xlu1 %v917_v8, %s1209_s0  ;;  %920 = vrot.lane.b32.xlu0 %v914_v46, %s1209_s0  ;;  %v532_v61 = vadd.f32 %v531_v52, %v530_v30  ;;  %v947_v39 = vrot.slane %v943_v18, 3 }
 0x273   :  { %v950_v50 = vsel %vm507_vm14, %v946_v32, 0.0  ;;  %v542_v21 = vrot.slane %v541_v27, 1 }
 0x274   :  { %v533_v0 = vrot.slane %v532_v61, 2  ;;  %v951_v54 = vrot.slane %v950_v50, 4  ;;  %v957_v55 = vsel %vm507_vm14, %v947_v39, 0.0 }
 0x276   :  { %v534_v9 = vadd.f32 %v533_v0, %v532_v61 }
 0x278   :  { %v535_v52 = vrot.slane %v534_v9, 1 }
 0x2c9   :  { %v479_v12 = vpop.permute.xlu0 %478  ;;  %v481_v19 = vpop.permute.xlu1 %480 }
 0x2ca   :  { %v483_v20 = vsel %vm482_vm15, %v479_v12, %v481_v19  ;;  %v484_v40 = vsel %vm482_vm15, %v481_v19, %v479_v12 }
 0x2cb   :  { %v505_v35 = vmul.f32 %v484_v40, %v1631_v49  ;;  %v506_v53 = vmul.f32 %v483_v20, %v1636_v25 }
 0x2cd   :  { %v508_v23 = vsel %vm507_vm14, %v505_v35, 0.0  ;;  %v515_v56 = vsel %vm507_vm14, %v506_v53, 0.0 }
 0x2ce   :  { %v509_v59 = vrot.slane %v508_v23, 4  ;;  %v516_v60 = vrot.slane %v515_v56, 4 }
 0x2d0   :  { %v510_v41 = vadd.f32 %v509_v59, %v508_v23  ;;  %v517_v16 = vadd.f32 %v516_v60, %v515_v56 }
 0x2d2   :  { %v511_v34 = vrot.slane %v510_v41, 2  ;;  %v518_v57 = vrot.slane %v517_v16, 2 }
 0x2d4   :  { %v499_v22 = vpop.permute.xlu0 %498  ;;  %v501_v29 = vpop.permute.xlu1 %500  ;;  %v512_v7 = vadd.f32 %v511_v34, %v510_v41  ;;  %v519_v8 = vadd.f32 %v518_v57, %v517_v16  ;;  %v536_v41 = vadd.f32 %v535_v52, %v534_v9  ;;  %v543_v34 = vadd.f32 %v542_v21, %v541_v27 }
 0x2d5   :  { %v503_v48 = vsel %vm502_vm0, %v499_v22, %v501_v29  ;;  %v504_v6 = vsel %vm502_vm0, %v501_v29, %v499_v22  ;;  %v958_v57 = vrot.slane %v957_v55, 4  ;;  %v576_v9 = vstv %s1728_s7  ;;  %s1210_s7 = smov [#allocation6]  }
 0x2d6   :  { %v558_v46 = vmul.f32 %v1664_v45, %v503_v48  ;;  %v559_v36 = vmul.f32 %v1667_v13, %v504_v6  ;;  %v513_v20 = vrot.slane %v512_v7, 1  ;;  %v520_v40 = vrot.slane %v519_v8, 1  ;;  %s1020_s19 = sshll.u32 %s1210_s7, 4  ;;  %s1021_s19 = int_to_ptr.vmem [resolvable:$true] %s1020_s19 }
 0x2d7   :  { %v952_v48 = vadd.f32 %v951_v54, %v950_v50  ;;  %s1177_s20 = scalar_lea.vmem %s1021_s19, 2048  ;;  %p1182_p6 = scmp.lt.s32.totalorder %s1021_s19, %s1021_s19 }
 0x2d8   :  { %v560_v37 = vsel %vm507_vm14, %v558_v46, 0.0  ;;  %v567_v30 = vsel %vm507_vm14, %v559_v36, 0.0  ;;  %v514_v62 = vadd.f32 %v513_v20, %v512_v7  ;;  %v521_v10 = vadd.f32 %v520_v40, %v519_v8  ;;  %p1178_p5 = scmp.ne.s32.totalorder %s1021_s19, %s1177_s20  ;;  %p1183_p7 = scmp.lt.s32.totalorder %s1177_s20, %s1177_s20 }
 0x2d9   :  { %v561_v12 = vrot.slane %v560_v37, 4  ;;  %v568_v19 = vrot.slane %v567_v30, 4  ;;  %v959_v36 = vadd.f32 %v958_v57, %v957_v55  ;;  %v953_v40 = vrot.slane %v952_v48, 2 }
 0x2da   :  { %v544_v6 = vadd.f32 %v536_v41, %v514_v62  ;;  %v545_v7 = vadd.f32 %v543_v34, %v521_v10  ;;  %p1184_p8 = por %p1183_p7, %p1182_p6 }
 0x2db   :  { %v562_v35 = vadd.f32 %v561_v12, %v560_v37  ;;  %v569_v53 = vadd.f32 %v568_v19, %v567_v30 }
 0x2dc   :  { %v903_v23 = vpop.permute.xlu0 %902  ;;  %v905_v56 = vpop.permute.xlu1 %904  ;;  %p1185_p9 = pnand %p1184_p8, %p1178_p5 }
 0x2dd   :  { %v563_v59 = vrot.slane %v562_v35, 2  ;;  %v570_v60 = vrot.slane %v569_v53, 2  ;;  %v906_v63 = vsel %vm482_vm15, %v903_v23, %v905_v56  ;;  %v907_v61 = vsel %vm482_vm15, %v905_v56, %v903_v23 }
 0x2de   :  { %v926_v47 = vmul.f32 %v907_v61, %v1631_v49  ;;  %v927_v11 = vmul.f32 %v906_v63, %v1636_v25  ;;  %v954_v61 = vadd.f32 %v953_v40, %v952_v48 }
 0x2df   :  { %v564_v16 = vadd.f32 %v563_v59, %v562_v35  ;;  %v571_v42 = vadd.f32 %v570_v60, %v569_v53  ;;  %v960_v53 = vrot.slane %v959_v36, 2 }
 0x2e0   :  { %v928_v0 = vsel %vm507_vm14, %v926_v47, 0.0  ;;  %v935_v43 = vsel %vm507_vm14, %v927_v11, 0.0 }
 0x2e1   :  { %v565_v18 = vrot.slane %v564_v16, 1  ;;  %v572_v22 = vrot.slane %v571_v42, 1  ;;  %v929_v29 = vrot.slane %v928_v0, 4  ;;  %v936_v32 = vrot.slane %v935_v43, 4 }
 0x2e2   :  { %v961_v62 = vadd.f32 %v960_v53, %v959_v36 }
 0x2e3   :  { %v566_v8 = vadd.f32 %v565_v18, %v564_v16  ;;  %v573_v49 = vadd.f32 %v572_v22, %v571_v42  ;;  %v930_v46 = vadd.f32 %v929_v29, %v928_v0  ;;  %v937_v25 = vadd.f32 %v936_v32, %v935_v43 }
 0x2e4   :  { %v921_v27 = vpop.permute.xlu0 %920  ;;  %v923_v39 = vpop.permute.xlu1 %922  ;;  %v955_v16 = vrot.slane %v954_v61, 1  ;;  %v962_v42 = vrot.slane %v961_v62, 1 }
 0x2e5   :  { %v574_v37 = vadd.f32 %v566_v8, %v544_v6  ;;  %v575_v30 = vadd.f32 %v573_v49, %v545_v7  ;;  %v931_v12 = vrot.slane %v930_v46, 2  ;;  %v938_v19 = vrot.slane %v937_v25, 2 }
 0x2e6   :  { %v924_v50 = vsel %vm502_vm0, %v921_v27, %v923_v39  ;;  %v925_v20 = vsel %vm502_vm0, %v923_v39, %v921_v27  ;;  %v956_v22 = vadd.f32 %v955_v16, %v954_v61  ;;  %v963_v32 = vadd.f32 %v962_v42, %v961_v62 }
 0x2e7   :  { %v577_v52 = vadd.f32 %v576_v9, %v574_v37  ;;  %v578_v35 = vadd.f32 %v576_v9, %v575_v30  ;;  %v966_v21 = vmul.f32 %v924_v50, %v1664_v45  ;;  %v967_v54 = vmul.f32 %v925_v20, %v1667_v13 }
 0x2e8   :  { %v932_v56 = vadd.f32 %v931_v12, %v930_v46  ;;  %v939_v59 = vadd.f32 %v938_v19, %v937_v25 }
 0x2e9   :  { %v1043_v55 = vmul.f32 -1.442695, %v577_v52  ;;  %v1044_v23 = vmul.f32 -1.442695, %v578_v35  ;;  %v968_v60 = vsel %vm507_vm14, %v966_v21, 0.0  ;;  %v975_v63 = vsel %vm507_vm14, %v967_v54, 0.0 }
 0x2ea   :  { %v969_v1 = vrot.slane %v968_v60, 4  ;;  %v976_v10 = vrot.slane %v975_v63, 4  ;;  %v933_v47 = vrot.slane %v932_v56, 1  ;;  %v940_v41 = vrot.slane %v939_v59, 1 }
 0x2eb   :  { %1141 = vpow2.f32 %v1043_v55 }
 0x2ec   :  { %1143 = vpow2.f32 %v1044_v23  ;;  %v970_v11 = vadd.f32 %v969_v1, %v968_v60  ;;  %v977_v45 = vadd.f32 %v976_v10, %v975_v63  ;;  %v934_v57 = vadd.f32 %v933_v47, %v932_v56 }
 0x2ed   :  { %v941_v43 = vadd.f32 %v940_v41, %v939_v59 }
 0x2ee   :  { %v971_v13 = vrot.slane %v970_v11, 2  ;;  %v978_v34 = vrot.slane %v977_v45, 2  ;;  %v964_v6 = vadd.f32 %v956_v22, %v934_v57 }
 0x2ef   :  { %v965_v8 = vadd.f32 %v963_v32, %v941_v43 }
 0x2f0   :  { %v972_v0 = vadd.f32 %v971_v13, %v970_v11  ;;  %v979_v18 = vadd.f32 %v978_v34, %v977_v45 }
 0x2f2   :  { %v973_v29 = vrot.slane %v972_v0, 1  ;;  %v980_v48 = vrot.slane %v979_v18, 1 }
 0x2f4   :  { %v974_v7 = vadd.f32 %v973_v29, %v972_v0  ;;  %v981_v49 = vadd.f32 %v980_v48, %v979_v18 }
 0x2f6   :  { %v982_v46 = vadd.f32 %v974_v7, %v964_v6  ;;  %v983_v36 = vadd.f32 %v981_v49, %v965_v8 }
 0x2f8   :  { %v1142_v25 = vpop.eup %1141  ;;  %v984_v37 = vadd.f32 %v982_v46, %v576_v9  ;;  %v985_v12 = vadd.f32 %v983_v36, %v576_v9 }
 0x2f9   :  { %v1144_v27 = vpop.eup %1143  ;;  %v585_v39 = vadd.f32 1.0, %v1142_v25 }
 0x2fa   :  { %v586_v30 = vadd.f32 1.0, %v1144_v27  ;;  %v1056_v19 = vmul.f32 -1.442695, %v984_v37  ;;  %v1057_v50 = vmul.f32 -1.442695, %v985_v12 }
 0x2fb   :  { %1145 = vrcp.f32 %v585_v39 }
 0x2fc   :  { %1147 = vrcp.f32 %v586_v30 }
 0x2fd   :  { %1149 = vpow2.f32 %v1056_v19 }
 0x2fe   :  { %1151 = vpow2.f32 %v1057_v50 }
 0x308   :  { %v1146_v20 = vpop.eup %1145 }
 0x309   :  { %v1148_v40 = vpop.eup %1147  ;;  %v591_v52 = vmul.f32 %v1146_v20, %v1465_v5  ;;  %v593_v35 = vmul.f32 %v1146_v20, %v1457_v26  ;;  %v595_v53 = vmul.f32 %v1146_v20, %v1449_v2  ;;  %v597_v21 = vmul.f32 %v1146_v20, %v1441_v24 }
 0x30a   :  { %v1150_v54 = vpop.eup %1149  ;;  %v592_v55 = vmul.f32 %v1148_v40, %v1461_v4  ;;  %v594_v9 = vmul.f32 %v1148_v40, %v1453_v3  ;;  %v596_v23 = vmul.f32 %v1148_v40, %v1445_v58  ;;  %v598_v56 = vmul.f32 %v1148_v40, %v1438_v33 }
 0x30b   :  { %v1152_v59 = vpop.eup %1151  ;;  %599 = vst [vmem:[#allocation6] sm:$0xff] %v591_v52  ;;  %601 = vst [vmem:[#allocation6 + $0x10] sm:$0xff] %v593_v35  ;;  %v992_v5 = vadd.f32 1.0, %v1150_v54 }
 0x30c   :  { %603 = vst [vmem:[#allocation6 + $0x20] sm:$0xff] %v595_v53  ;;  %605 = vst [vmem:[#allocation6 + $0x30] sm:$0xff] %v597_v21  ;;  %v993_v24 = vadd.f32 1.0, %v1152_v59 }
 0x30d   :  { %600 = vst [vmem:[#allocation6 + $0x8] sm:$0xff] %v592_v55  ;;  %602 = vst [vmem:[#allocation6 + $0x18] sm:$0xff] %v594_v9  ;;  %1153 = vrcp.f32 %v992_v5 }
 0x30e   :  { %604 = vst [vmem:[#allocation6 + $0x28] sm:$0xff] %v596_v23  ;;  %606 = vst [vmem:[#allocation6 + $0x38] sm:$0xff] %v598_v56  ;;  %1155 = vrcp.f32 %v993_v24 }
 0x31a   :  { %v1154_v2 = vpop.eup %1153 }
 0x31b   :  { %v1156_v3 = vpop.eup %1155  ;;  %v998_v58 = vmul.f32 %v1154_v2, %v1507_v17  ;;  %v1000_v33 = vmul.f32 %v1154_v2, %v1499_v14  ;;  %v1002_v26 = vmul.f32 %v1154_v2, %v1491_v44  ;;  %v1004_v4 = vmul.f32 %v1154_v2, %v1483_v28 }
 0x31c   :  { %v999_v60 = vmul.f32 %v1156_v3, %v1503_v15  ;;  %v1001_v63 = vmul.f32 %v1156_v3, %v1495_v38  ;;  %v1003_v61 = vmul.f32 %v1156_v3, %v1487_v51  ;;  %v1005_v1 = vmul.f32 %v1156_v3, %v1479_v31 }
 0x31d   :  { %1007 = vst [vmem:[#allocation6 + $0x40] sm:$0xff] %v998_v58  ;;  %1009 = vst [vmem:[#allocation6 + $0x50] sm:$0xff] %v1000_v33 }
 0x31e   :  { %1011 = vst [vmem:[#allocation6 + $0x60] sm:$0xff] %v1002_v26  ;;  %1013 = vst [vmem:[#allocation6 + $0x70] sm:$0xff] %v1004_v4 }
 0x31f   :  { %1008 = vst [vmem:[#allocation6 + $0x48] sm:$0xff] %v999_v60  ;;  %1010 = vst [vmem:[#allocation6 + $0x58] sm:$0xff] %v1001_v63 }
 0x320   :  { %1012 = vst [vmem:[#allocation6 + $0x68] sm:$0xff] %v1003_v61  ;;  %1014 = vst [vmem:[#allocation6 + $0x78] sm:$0xff] %v1005_v1 }
 0x321   :  { %1188 = shalt.err (!%p1185_p9)
}
 0x322   :  { %1026 = dma.vmem_to_hbm [thread:$0]  %s1021_s19, 2048, %s1729_s8, [#allocation5], %s1202_s30, %s1202_s30, %s1203_s9  }
 0x323   :  { %1199 = dma.done.wait [#allocation5], 2048  }
 0x324   :  { %1200 = vsyncadd [#allocation5], 4294965248 }
 0x325   :  { %1030 = vsyncpa [#allocation4], 1 }
 0x326   :  { %1031 = vsyncpa [#allocation5], 1 }

</bundles_post_ra>
